<compile_context>
chip_gen: v5e
topology: v5e:2x2
jax: 0.10.0
libtpu: 0.0.40
codegen_flags: <defaults>
</compile_context>

<pallas_src>
import jax
import jax.numpy as jnp
from jax.experimental import pallas as pl
from jax.experimental.pallas import tpu as pltpu

H1, H2 = 10, 20          # true hidden widths
H1P, H2P = 16, 24        # sublane-aligned padded widths
# Packed-parameter slab (rows = H2P = 24), column layout:
#   cols  0..15 : W2^T (24 x 16)  [rows 0..19 / cols 0..9 real, rest zero]
#   col   16    : w1   (rows 0..9 real)
#   col   17    : b1   (rows 0..9 real)
#   col   18    : b2   (rows 0..19 real)
#   col   19    : w3   (rows 0..19 real)
#   col   20    : b3   (row 0)
P_COLS = 24


def mlp_kernel(x_ref, p_ref, o_ref):
    x = x_ref[...]                        # (1, NP)  batch on lanes
    p = p_ref[...]                        # (24, 24) whole parameter slab, one load
    w1 = p[0:H1P, 16:17]                  # (16, 1)
    b1 = p[0:H1P, 17:18]                  # (16, 1)
    w2 = p[:, 0:H1P]                      # (24, 16)
    b2 = p[:, 18:19]                      # (24, 1)
    w3 = p[:, 19:20]                      # (24, 1)
    b3 = p[0:1, 20:21]                    # (1, 1)

    # Layer 1 (K=1): pure VPU broadcast multiply-add — no MXU pass for 1 MAC/elem.
    h1 = jnp.maximum(w1 * x + b1, 0.0)                            # (16, NP)
    # Layer 2: single small MXU pass on zero-padded, sublane-aligned operands.
    h2 = jnp.dot(w2, h1, preferred_element_type=jnp.float32) + b2
    h2 = jnp.maximum(h2, 0.0)                                     # (24, NP)
    # Layer 3 (K=20): VPU multiply + XLU sublane reduce (MXU stays idle).
    out = jnp.sum(h2 * w3, axis=0, keepdims=True) + b3            # (1, NP)
    o_ref[...] = out.astype(o_ref.dtype)                          # lane-dense unmasked store


def pack_params(params):
    """Pack the six Linear params into one zero-padded (24, 24) f32 slab."""
    w1, b1, w2, b2, w3, b3 = params  # (1,10),(1,10),(10,20),(1,20),(20,1),(1,1)
    slab = jnp.zeros((H2P, P_COLS), jnp.float32)
    slab = slab.at[:H2, :H1].set(w2.T)          # W2^T
    slab = slab.at[:H1, 16].set(w1[0, :])
    slab = slab.at[:H1, 17].set(b1[0, :])
    slab = slab.at[:H2, 18].set(b2[0, :])
    slab = slab.at[:H2, 19].set(w3[:, 0])
    slab = slab.at[0, 20].set(b3[0, 0])
    return slab


def _padded_batch(n):
    return max(128, ((n + 127) // 128) * 128)


@jax.jit
def my_network_forward(x, packed_params):
    n = x.shape[0]
    npad = _padded_batch(n)
    # Batch onto lanes: (n, 1) -> zero-padded (1, npad).
    x_t = jnp.zeros((1, npad), jnp.float32).at[0, :n].set(x[:, 0])

    vmem = pl.BlockSpec(memory_space=pltpu.MemorySpace.VMEM)
    flops = 2 * n * (1 * H1 + H1 * H2 + H2 * 1)
    bytes_accessed = 4 * (npad + H2P * P_COLS + npad)

    out_t = pl.pallas_call(
        mlp_kernel,
        out_shape=jax.ShapeDtypeStruct((1, npad), jnp.float32),
        in_specs=[vmem, vmem],
        out_specs=vmem,
        cost_estimate=pl.CostEstimate(
            flops=flops, transcendentals=0, bytes_accessed=bytes_accessed),
    )(x_t, packed_params)
    # Back to the module's (batch, 1) layout; drop the lane padding.
    return out_t[0, :n].reshape(n, 1)


def init_params(key):
    """Deterministic init matching nn.Linear shapes: (1->10), (10->20), (20->1).

    PyTorch uses uniform(-1/sqrt(fan_in), 1/sqrt(fan_in)); we reproduce that
    distributionally (exact values differ from torch.manual_seed(42))."""
    def linear_init(k, fan_in, fan_out):
        kw, kb = jax.random.split(k)
        bound = 1.0 / jnp.sqrt(jnp.float32(fan_in))
        w = jax.random.uniform(kw, (fan_in, fan_out), jnp.float32, -bound, bound)
        b = jax.random.uniform(kb, (1, fan_out), jnp.float32, -bound, bound)
        return w, b

    k1, k2, k3 = jax.random.split(key, 3)
    w1, b1 = linear_init(k1, 1, 10)
    w2, b2 = linear_init(k2, 10, 20)
    w3, b3 = linear_init(k3, 20, 1)
    return (w1, b1, w2, b2, w3, b3)


if __name__ == "__main__":
    key = jax.random.PRNGKey(0)
    params = init_params(key)
    packed = pack_params(params)

    # Same input as the reference script: x = linspace(-10, 10, 50).view(-1, 1)
    x = jnp.linspace(-10.0, 10.0, 50, dtype=jnp.float32).reshape(-1, 1)

    y = my_network_forward(x, packed)
    jax.block_until_ready(y)

    # Pure-JAX reference check of the same math (unpacked, unpadded).
    w1, b1, w2, b2, w3, b3 = params
    ref = jnp.maximum(x @ w1 + b1, 0.0)
    ref = jnp.maximum(ref @ w2 + b2, 0.0)
    ref = ref @ w3 + b3
    assert y.shape == (50, 1)
    assert jnp.allclose(y, ref, atol=1e-5, rtol=1e-5)

    print("KERNEL_OK")
</pallas_src>

<mosaic_0001>
module attributes {stable_mosaic.version = 11 : i64} {
  func.func @mlp_kernel(%arg0: memref<1x128xf32, #tpu.memory_space<vmem>>, %arg1: memref<24x24xf32, #tpu.memory_space<vmem>>, %arg2: memref<1x128xf32, #tpu.memory_space<vmem>>) attributes {dimension_semantics = [], scalar_prefetch = 0 : i64, scratch_operands = 0 : i64, tpu.core_type = #tpu.core_type<tc>} {
    %c0 = arith.constant 0 : index
    %c0_0 = arith.constant 0 : index
    %0 = vector.load %arg0[%c0, %c0_0] : memref<1x128xf32, #tpu.memory_space<vmem>>, vector<1x128xf32>
    %c0_1 = arith.constant 0 : index
    %c0_2 = arith.constant 0 : index
    %1 = vector.load %arg1[%c0_1, %c0_2] : memref<24x24xf32, #tpu.memory_space<vmem>>, vector<24x24xf32>
    %2 = vector.extract_strided_slice %1 {offsets = [0, 16], sizes = [16, 1], strides = [1, 1]} : vector<24x24xf32> to vector<16x1xf32>
    %3 = vector.extract_strided_slice %1 {offsets = [0, 17], sizes = [16, 1], strides = [1, 1]} : vector<24x24xf32> to vector<16x1xf32>
    %4 = vector.extract_strided_slice %1 {offsets = [0, 0], sizes = [24, 16], strides = [1, 1]} : vector<24x24xf32> to vector<24x16xf32>
    %5 = vector.extract_strided_slice %1 {offsets = [0, 18], sizes = [24, 1], strides = [1, 1]} : vector<24x24xf32> to vector<24x1xf32>
    %6 = vector.extract_strided_slice %1 {offsets = [0, 19], sizes = [24, 1], strides = [1, 1]} : vector<24x24xf32> to vector<24x1xf32>
    %7 = vector.extract_strided_slice %1 {offsets = [0, 20], sizes = [1, 1], strides = [1, 1]} : vector<24x24xf32> to vector<1x1xf32>
    %8 = vector.broadcast %2 : vector<16x1xf32> to vector<16x128xf32>
    %9 = vector.broadcast %0 : vector<1x128xf32> to vector<16x128xf32>
    %10 = arith.mulf %8, %9 : vector<16x128xf32>
    %11 = vector.broadcast %3 : vector<16x1xf32> to vector<16x128xf32>
    %12 = arith.addf %10, %11 : vector<16x128xf32>
    %cst = arith.constant 0.000000e+00 : f32
    %13 = vector.broadcast %cst : f32 to vector<16x128xf32>
    %14 = arith.maximumf %12, %13 : vector<16x128xf32>
    %cst_3 = arith.constant dense<0.000000e+00> : vector<24x128xf32>
    %15 = tpu.matmul %4, %14, %cst_3 {dimension_numbers = #tpu.dot_dimension_numbers<[1], [0], [0], [1], [0, 0, 1, 1], [], []>} : vector<24x16xf32>, vector<16x128xf32>, vector<24x128xf32> -> vector<24x128xf32>
    %16 = vector.broadcast %5 : vector<24x1xf32> to vector<24x128xf32>
    %17 = arith.addf %15, %16 : vector<24x128xf32>
    %cst_4 = arith.constant 0.000000e+00 : f32
    %18 = vector.broadcast %cst_4 : f32 to vector<24x128xf32>
    %19 = arith.maximumf %17, %18 : vector<24x128xf32>
    %20 = vector.broadcast %6 : vector<24x1xf32> to vector<24x128xf32>
    %21 = arith.mulf %19, %20 : vector<24x128xf32>
    %cst_5 = arith.constant dense<0.000000e+00> : vector<128xf32>
    %22 = vector.multi_reduction <add>, %21, %cst_5 [0] : vector<24x128xf32> to vector<128xf32>
    %23 = vector.shape_cast %22 : vector<128xf32> to vector<1x128xf32>
    %24 = vector.broadcast %7 : vector<1x1xf32> to vector<1x128xf32>
    %25 = arith.addf %23, %24 : vector<1x128xf32>
    %c0_6 = arith.constant 0 : index
    %c0_7 = arith.constant 0 : index
    %26 = vector.load %arg2[%c0_6, %c0_7] : memref<1x128xf32, #tpu.memory_space<vmem>>, vector<1x128xf32>
    tpu.vector_store %arg2[%c0_6, %c0_7], %25 {strides = array<i32>} : memref<1x128xf32, #tpu.memory_space<vmem>>, vector<1x128xf32>,
    return
  }
}

</mosaic_0001>

<bundles_post_ra>
// kernel: my_network_forward.1
= control target key start
LH: loop header
LB: loop body
LE: loop exit
PB: predicated region body
PF: predicated region fallthrough
CT: control target
= control target key end

     0   :  { %7 = vsyncpa [#allocation3], 0  ;;  %s191_s12 = smov [#allocation2]   ;;  %s192_s14 = smov 128   ;;  %s223_s0 = inlined_call_operand.vmem [shape: f32[1,128], index: 0, kind: input, shape index: {}]   ;;  %s224_s1 = inlined_call_operand.hbm [shape: f32[24,24], index: 1, kind: input, shape index: {}]   ;;  %s225_s2 = inlined_call_operand.vmem [shape: f32[1,128], index: 2, kind: output, shape index: {}]  }
   0x1   :  { %s14_s11 = sshll.u32 %s224_s1, 4  ;;  %s16_s13 = sshll.u32 %s191_s12, 4  ;;  %s15_s11 = int_to_ptr.hbm [resolvable:$true] %s14_s11  ;;  %s17_s13 = int_to_ptr.vmem [resolvable:$true] %s16_s13 }
   0x2   :  { %s193_s15 = smov 8  }
   0x3   :  { %22 = dma.hbm_to_vmem [thread:$0]  %s15_s11, 384, %s17_s13, [#allocation3], %s192_s14, %s192_s14, %s193_s15  }
   0x4   :  { %189 = dma.done.wait [#allocation3], 384  }
   0x5   :  { %190 = vsyncadd [#allocation3], 4294966912  ;;  %v194_v0 = vmov 17   ;;  %v195_v1 = vmov 16   ;;  %v29_v2 = vld [vmem:[#allocation2 + $0x8] sm:$0xff]  ;;  %v28_v3 = vld [vmem:[#allocation2] sm:$0xff] }
   0x6   :  { %157 = vset.pattern.permute.xlu1 %v194_v0  ;;  %156 = vset.pattern.permute.xlu0 %v195_v1  ;;  %v196_v4 = vmov 19   ;;  %v197_v5 = vmov 18   ;;  %v30_v6 = vld [vmem:[#allocation2 + $0x10] sm:$0xff]  ;;  %v198_v7 = vmov 20   ;;  %v164_v8 = vld [vmem:[%s223_s0] ss:$0 sm:$0xff] }
   0x7   :  { %51 = vperm.xlu1 %157, %v29_v2   ;;  %38 = vperm.xlu0 %156, %v29_v2   ;;  %vm71_vm0 = vcmask 130048  }
   0x8   :  { %158 = vset.pattern.permute.xlu2 %v197_v5 }
   0x9   :  { %59 = vperm.xlu2 %158, %v28_v3  }
   0xf   :  { %47 = vperm.xlu1 %157, %v28_v3   ;;  %33 = vperm.xlu0 %156, %v28_v3  }
  0x11   :  { %63 = vperm.xlu2 %158, %v29_v2  }
  0x17   :  { %160 = vset.pattern.permute.xlu1 %v196_v4  ;;  %159 = vset.pattern.permute.xlu0 %v197_v5 }
  0x18   :  { %108 = vperm.xlu1 %160, %v28_v3   ;;  %68 = vperm.xlu0 %159, %v30_v6  }
  0x19   :  { %161 = vset.pattern.permute.xlu2 %v196_v4 }
  0x1a   :  { %112 = vperm.xlu2 %161, %v29_v2  }
  0x20   :  { %116 = vperm.xlu1 %160, %v30_v6   ;;  %163 = vset.pattern.permute.xlu0 %v198_v7 }
  0x22   :  { %162 = vset.pattern.permute.xlu2 %v198_v7 }
  0x23   :  { %131 = vperm.xlu2 %162, %v28_v3  }
  0x63   :  { %v60_v19 = vpop.permute.xlu2 %59 }
  0x6b   :  { %v64_v20 = vpop.permute.xlu2 %63 }
  0x74   :  { %v113_v28 = vpop.permute.xlu2 %112 }
  0x79   :  { %v52_v9 = vpop.permute.xlu1 %51  ;;  %v39_v10 = vpop.permute.xlu0 %38 }
  0x7a   :  { %v45_v11 = vmul.f32 %v164_v8, %v39_v10 }
  0x7c   :  { %v55_v12 = vadd.f32 %v52_v9, %v45_v11 }
  0x7d   :  { %v132_v44 = vpop.permute.xlu2 %131 }
  0x7e   :  { %v57_v13 = vmax.f32 %v55_v12, 0.0 }
  0x80   :  { %92 = vmatpush.msra.mxu0 %v57_v13  ;;  %144 = vmatpush.msra.mxu1 %v57_v13 }
  0x81   :  { %145 = vmatpush.msra.mxu2 %v57_v13  ;;  %v34_v14 = vpop.permute.xlu0 %33  ;;  %v48_v16 = vpop.permute.xlu1 %47 }
  0x82   :  { %v44_v15 = vmul.f32 %v164_v8, %v34_v14 }
  0x84   :  { %v54_v17 = vadd.f32 %v48_v16, %v44_v15 }
  0x86   :  { %v56_v18 = vmax.f32 %v54_v17, 0.0 }
  0x88   :  { %93 = vmatpush.msra.mxu0 %v56_v18  ;;  %146 = vmatpush.msra.mxu1 %v56_v18 }
  0x89   :  { %147 = vmatpush.msra.mxu2 %v56_v18  ;;  %141 = vmatmul.msk.f32.vlgmr.msra.gmra.mxu0 %vm71_vm0, %v28_v3 }
  0x8a   :  { %142 = vmatmul.msk.f32.vlgmr.msra.gmra.mxu1 %vm71_vm0, %v29_v2  ;;  %143 = vmatmul.msk.f32.vlgmr.msra.gmra.mxu2 %vm71_vm0, %v30_v6  ;;  %v109_v22 = vpop.permute.xlu1 %108  ;;  %v69_v29 = vpop.permute.xlu0 %68 }
  0x92   :  { %v117_v35 = vpop.permute.xlu1 %116 }
 0x106   :  { %v95_v21 = vpop.f32.mrf.mxu0 }
 0x107   :  { %v96_v23 = vadd.f32 %v95_v21, %v60_v19  ;;  %v98_v24 = vpop.f32.mrf.mxu1 }
 0x108   :  { %v99_v25 = vadd.f32 %v98_v24, %v64_v20 }
 0x109   :  { %v104_v26 = vmax.f32 %v96_v23, 0.0 }
 0x10a   :  { %v105_v27 = vmax.f32 %v99_v25, 0.0 }
 0x10b   :  { %v119_v31 = vmul.f32 %v109_v22, %v104_v26 }
 0x10c   :  { %v120_v32 = vmul.f32 %v113_v28, %v105_v27 }
 0x10d   :  { %v101_v30 = vpop.f32.mrf.mxu2 }
 0x10e   :  { %v102_v33 = vadd.f32 %v101_v30, %v69_v29  ;;  %v122_v36 = vadd.f32 %v120_v32, %v119_v31 }
 0x110   :  { %v106_v34 = vmax.f32 %v102_v33, 0.0 }
 0x112   :  { %v121_v37 = vmul.f32 %v117_v35, %v106_v34 }
 0x114   :  { %v123_v38 = vadd.f32 %v122_v36, %v121_v37 }
 0x116   :  { %v124_v39 = vrot.slane %v123_v38, 4 }
 0x118   :  { %v125_v40 = vadd.f32 %v124_v39, %v123_v38 }
 0x11a   :  { %v126_v41 = vrot.slane %v125_v40, 2 }
 0x11c   :  { %v127_v42 = vadd.f32 %v126_v41, %v125_v40 }
 0x11e   :  { %v128_v43 = vrot.slane %v127_v42, 1 }
 0x120   :  { %v129_v45 = vadd.f32 %v128_v43, %v127_v42 }
 0x122   :  { %v134_v46 = vadd.f32 %v132_v44, %v129_v45 }
 0x124   :  { %135 = vst [vmem:[%s225_s2] sm:$0x1] %v134_v46 }
 0x125   :  { %140 = vsyncpa [#allocation3], 1 }

</bundles_post_ra>
